<compile_context>
chip_gen: v5e
topology: v5e:2x2
jax: 0.10.0
libtpu: 0.0.40
codegen_flags: <defaults>
</compile_context>

<pallas_src>
import jax
import jax.numpy as jnp
from jax.experimental import pallas as pl
from jax.experimental.pallas import tpu as pltpu


LAYER_SIZES = (4, 16, 16, 8, 3)


def _elu(x):
    # torch.nn.ELU(alpha=1.0): x if x > 0 else exp(x) - 1
    # min(x, 0) keeps exp() from overflowing on the unselected branch.
    return jnp.where(x > 0, x, jnp.exp(jnp.minimum(x, 0.0)) - 1.0)


def _make_mlp_kernel(n_layers):
    def kernel(*refs):
        x_ref = refs[0]
        out_ref = refs[-1]
        h = x_ref[...].astype(jnp.float32)                      # [TB, D_in]
        for li in range(n_layers):
            w = refs[1 + 2 * li][...].astype(jnp.float32)       # [D_in_i, D_out_i]
            b = refs[2 + 2 * li][...].astype(jnp.float32)       # [1, D_out_i]
            h = jnp.dot(h, w, preferred_element_type=jnp.float32) + b
            if li < n_layers - 1:
                h = _elu(h)
        out_ref[...] = h.astype(out_ref.dtype)                  # [TB, D_out]
    return kernel


def _round_up(x, m):
    return (x + m - 1) // m * m


def mlp_forward(x, params, *, tb_max=4096):
    """x: [B, D_in] float32, params: list of (w:[din,dout], b:[1,dout]) -> [B, D_out]."""
    B, d_in = x.shape
    assert d_in == params[0][0].shape[0]
    d_out = params[-1][0].shape[1]
    n_layers = len(params)

    # Batch tile: multiple of 8 (sublane), capped so VMEM stays tiny even on v7x.
    TB = min(_round_up(B, 8), tb_max)
    B_pad = _round_up(B, TB)
    if B_pad != B:
        x = jnp.pad(x, ((0, B_pad - B), (0, 0)))
    grid = (pl.cdiv(B_pad, TB),)

    in_specs = [pl.BlockSpec((TB, d_in), lambda i: (i, 0))]
    flat_params = []
    for w, b in params:
        in_specs.append(pl.BlockSpec(w.shape, lambda i: (0, 0)))  # weights resident
        in_specs.append(pl.BlockSpec(b.shape, lambda i: (0, 0)))  # biases resident
        flat_params.extend([w, b])

    out = pl.pallas_call(
        _make_mlp_kernel(n_layers),
        out_shape=jax.ShapeDtypeStruct((B_pad, d_out), x.dtype),
        grid=grid,
        in_specs=in_specs,
        out_specs=pl.BlockSpec((TB, d_out), lambda i: (i, 0)),
        compiler_params=pltpu.CompilerParams(
            dimension_semantics=("parallel",),
        ),
    )(x, *flat_params)
    return out[:B]


def mlp_ref(x, params):
    h = x
    for i, (w, b) in enumerate(params):
        h = h @ w + b
        if i < len(params) - 1:
            h = _elu(h)
    return h


if __name__ == "__main__":
    key = jax.random.PRNGKey(0)
    n_layers = len(LAYER_SIZES) - 1
    keys = jax.random.split(key, 1 + 2 * n_layers)

    B = 8
    x = jax.random.normal(keys[0], (B, LAYER_SIZES[0]), dtype=jnp.float32)

    # PyTorch-style Linear init: U(-1/sqrt(fan_in), 1/sqrt(fan_in)).
    # Weights stored as [in, out] (== transpose of torch's [out, in]) so the
    # forward is x @ W + b — same math as torch's x @ W.T + b.
    params = []
    kidx = 1
    for i in range(1, len(LAYER_SIZES)):
        fan_in, fan_out = LAYER_SIZES[i - 1], LAYER_SIZES[i]
        bound = float(fan_in) ** -0.5
        w = jax.random.uniform(keys[kidx], (fan_in, fan_out), jnp.float32, -bound, bound)
        b = jax.random.uniform(keys[kidx + 1], (1, fan_out), jnp.float32, -bound, bound)
        params.append((w, b))
        kidx += 2

    out = mlp_forward(x, params)
    jax.block_until_ready(out)

    ref = mlp_ref(x, params)
    assert out.shape == (B, LAYER_SIZES[-1])
    assert jnp.allclose(out, ref, atol=1e-5, rtol=1e-5)

    print("KERNEL_OK")
</pallas_src>

<mosaic_0001>
module attributes {stable_mosaic.version = 11 : i64} {
  func.func @kernel(%arg0: i32, %arg1: memref<8x4xf32, #tpu.memory_space<vmem>>, %arg2: memref<4x16xf32, #tpu.memory_space<vmem>>, %arg3: memref<1x16xf32, #tpu.memory_space<vmem>>, %arg4: memref<16x16xf32, #tpu.memory_space<vmem>>, %arg5: memref<1x16xf32, #tpu.memory_space<vmem>>, %arg6: memref<16x8xf32, #tpu.memory_space<vmem>>, %arg7: memref<1x8xf32, #tpu.memory_space<vmem>>, %arg8: memref<8x3xf32, #tpu.memory_space<vmem>>, %arg9: memref<1x3xf32, #tpu.memory_space<vmem>>, %arg10: memref<8x3xf32, #tpu.memory_space<vmem>>) attributes {dimension_semantics = [#tpu.dimension_semantics<parallel>], iteration_bounds = array<i64: 1>, scalar_prefetch = 0 : i64, scratch_operands = 0 : i64, tpu.core_type = #tpu.core_type<tc>, window_params = [{transform_indices = @transform_0, window_bounds = array<i64: 8, 4>}, {pipeline_mode = #tpu.pipeline_mode<synchronous>, transform_indices = @transform_1, window_bounds = array<i64: 4, 16>}, {pipeline_mode = #tpu.pipeline_mode<synchronous>, transform_indices = @transform_2, window_bounds = array<i64: 1, 16>}, {pipeline_mode = #tpu.pipeline_mode<synchronous>, transform_indices = @transform_3, window_bounds = array<i64: 16, 16>}, {pipeline_mode = #tpu.pipeline_mode<synchronous>, transform_indices = @transform_4, window_bounds = array<i64: 1, 16>}, {pipeline_mode = #tpu.pipeline_mode<synchronous>, transform_indices = @transform_5, window_bounds = array<i64: 16, 8>}, {pipeline_mode = #tpu.pipeline_mode<synchronous>, transform_indices = @transform_6, window_bounds = array<i64: 1, 8>}, {pipeline_mode = #tpu.pipeline_mode<synchronous>, transform_indices = @transform_7, window_bounds = array<i64: 8, 3>}, {pipeline_mode = #tpu.pipeline_mode<synchronous>, transform_indices = @transform_8, window_bounds = array<i64: 1, 3>}, {transform_indices = @transform_9, window_bounds = array<i64: 8, 3>}]} {
    %c0 = arith.constant 0 : index
    %c0_0 = arith.constant 0 : index
    %0 = vector.load %arg1[%c0, %c0_0] : memref<8x4xf32, #tpu.memory_space<vmem>>, vector<8x4xf32>
    %c0_1 = arith.constant 0 : index
    %c0_2 = arith.constant 0 : index
    %1 = vector.load %arg2[%c0_1, %c0_2] : memref<4x16xf32, #tpu.memory_space<vmem>>, vector<4x16xf32>
    %c0_3 = arith.constant 0 : index
    %c0_4 = arith.constant 0 : index
    %2 = vector.load %arg3[%c0_3, %c0_4] : memref<1x16xf32, #tpu.memory_space<vmem>>, vector<1x16xf32>
    %cst = arith.constant dense<0.000000e+00> : vector<8x16xf32>
    %3 = tpu.matmul %0, %1, %cst {dimension_numbers = #tpu.dot_dimension_numbers<[1], [0], [0], [1], [0, 0, 1, 1], [], []>} : vector<8x4xf32>, vector<4x16xf32>, vector<8x16xf32> -> vector<8x16xf32>
    %4 = vector.broadcast %2 : vector<1x16xf32> to vector<8x16xf32>
    %5 = arith.addf %3, %4 : vector<8x16xf32>
    %cst_5 = arith.constant 0.000000e+00 : f32
    %6 = vector.broadcast %cst_5 : f32 to vector<8x16xf32>
    %7 = arith.cmpf ogt, %5, %6 : vector<8x16xf32>
    %cst_6 = arith.constant 0.000000e+00 : f32
    %8 = vector.broadcast %cst_6 : f32 to vector<8x16xf32>
    %9 = arith.minimumf %5, %8 : vector<8x16xf32>
    %10 = math.exp %9 : vector<8x16xf32>
    %cst_7 = arith.constant 1.000000e+00 : f32
    %11 = vector.broadcast %cst_7 : f32 to vector<8x16xf32>
    %12 = arith.subf %10, %11 : vector<8x16xf32>
    %13 = arith.select %7, %5, %12 : vector<8x16xi1>, vector<8x16xf32>
    %c0_8 = arith.constant 0 : index
    %c0_9 = arith.constant 0 : index
    %14 = vector.load %arg4[%c0_8, %c0_9] : memref<16x16xf32, #tpu.memory_space<vmem>>, vector<16x16xf32>
    %c0_10 = arith.constant 0 : index
    %c0_11 = arith.constant 0 : index
    %15 = vector.load %arg5[%c0_10, %c0_11] : memref<1x16xf32, #tpu.memory_space<vmem>>, vector<1x16xf32>
    %cst_12 = arith.constant dense<0.000000e+00> : vector<8x16xf32>
    %16 = tpu.matmul %13, %14, %cst_12 {dimension_numbers = #tpu.dot_dimension_numbers<[1], [0], [0], [1], [0, 0, 1, 1], [], []>} : vector<8x16xf32>, vector<16x16xf32>, vector<8x16xf32> -> vector<8x16xf32>
    %17 = vector.broadcast %15 : vector<1x16xf32> to vector<8x16xf32>
    %18 = arith.addf %16, %17 : vector<8x16xf32>
    %cst_13 = arith.constant 0.000000e+00 : f32
    %19 = vector.broadcast %cst_13 : f32 to vector<8x16xf32>
    %20 = arith.cmpf ogt, %18, %19 : vector<8x16xf32>
    %cst_14 = arith.constant 0.000000e+00 : f32
    %21 = vector.broadcast %cst_14 : f32 to vector<8x16xf32>
    %22 = arith.minimumf %18, %21 : vector<8x16xf32>
    %23 = math.exp %22 : vector<8x16xf32>
    %cst_15 = arith.constant 1.000000e+00 : f32
    %24 = vector.broadcast %cst_15 : f32 to vector<8x16xf32>
    %25 = arith.subf %23, %24 : vector<8x16xf32>
    %26 = arith.select %20, %18, %25 : vector<8x16xi1>, vector<8x16xf32>
    %c0_16 = arith.constant 0 : index
    %c0_17 = arith.constant 0 : index
    %27 = vector.load %arg6[%c0_16, %c0_17] : memref<16x8xf32, #tpu.memory_space<vmem>>, vector<16x8xf32>
    %c0_18 = arith.constant 0 : index
    %c0_19 = arith.constant 0 : index
    %28 = vector.load %arg7[%c0_18, %c0_19] : memref<1x8xf32, #tpu.memory_space<vmem>>, vector<1x8xf32>
    %cst_20 = arith.constant dense<0.000000e+00> : vector<8x8xf32>
    %29 = tpu.matmul %26, %27, %cst_20 {dimension_numbers = #tpu.dot_dimension_numbers<[1], [0], [0], [1], [0, 0, 1, 1], [], []>} : vector<8x16xf32>, vector<16x8xf32>, vector<8x8xf32> -> vector<8x8xf32>
    %30 = vector.broadcast %28 : vector<1x8xf32> to vector<8x8xf32>
    %31 = arith.addf %29, %30 : vector<8x8xf32>
    %cst_21 = arith.constant 0.000000e+00 : f32
    %32 = vector.broadcast %cst_21 : f32 to vector<8x8xf32>
    %33 = arith.cmpf ogt, %31, %32 : vector<8x8xf32>
    %cst_22 = arith.constant 0.000000e+00 : f32
    %34 = vector.broadcast %cst_22 : f32 to vector<8x8xf32>
    %35 = arith.minimumf %31, %34 : vector<8x8xf32>
    %36 = math.exp %35 : vector<8x8xf32>
    %cst_23 = arith.constant 1.000000e+00 : f32
    %37 = vector.broadcast %cst_23 : f32 to vector<8x8xf32>
    %38 = arith.subf %36, %37 : vector<8x8xf32>
    %39 = arith.select %33, %31, %38 : vector<8x8xi1>, vector<8x8xf32>
    %c0_24 = arith.constant 0 : index
    %c0_25 = arith.constant 0 : index
    %40 = vector.load %arg8[%c0_24, %c0_25] : memref<8x3xf32, #tpu.memory_space<vmem>>, vector<8x3xf32>
    %c0_26 = arith.constant 0 : index
    %c0_27 = arith.constant 0 : index
    %41 = vector.load %arg9[%c0_26, %c0_27] : memref<1x3xf32, #tpu.memory_space<vmem>>, vector<1x3xf32>
    %cst_28 = arith.constant dense<0.000000e+00> : vector<8x3xf32>
    %42 = tpu.matmul %39, %40, %cst_28 {dimension_numbers = #tpu.dot_dimension_numbers<[1], [0], [0], [1], [0, 0, 1, 1], [], []>} : vector<8x8xf32>, vector<8x3xf32>, vector<8x3xf32> -> vector<8x3xf32>
    %43 = vector.broadcast %41 : vector<1x3xf32> to vector<8x3xf32>
    %44 = arith.addf %42, %43 : vector<8x3xf32>
    %c0_29 = arith.constant 0 : index
    %c0_30 = arith.constant 0 : index
    %45 = vector.load %arg10[%c0_29, %c0_30] : memref<8x3xf32, #tpu.memory_space<vmem>>, vector<8x3xf32>
    tpu.vector_store %arg10[%c0_29, %c0_30], %44 {strides = array<i32>} : memref<8x3xf32, #tpu.memory_space<vmem>>, vector<8x3xf32>,
    return
  }
  func.func @transform_0(%arg0: i32) -> (i32, i32) {
    %c0_i32 = arith.constant 0 : i32
    %c0_i32_0 = arith.constant 0 : i32
    return %arg0, %c0_i32 : i32, i32
  }
  func.func @transform_1(%arg0: i32) -> (i32, i32) {
    %c0_i32 = arith.constant 0 : i32
    %c0_i32_0 = arith.constant 0 : i32
    %c0_i32_1 = arith.constant 0 : i32
    return %c0_i32, %c0_i32_0 : i32, i32
  }
  func.func @transform_2(%arg0: i32) -> (i32, i32) {
    %c0_i32 = arith.constant 0 : i32
    %c0_i32_0 = arith.constant 0 : i32
    %c0_i32_1 = arith.constant 0 : i32
    return %c0_i32, %c0_i32_0 : i32, i32
  }
  func.func @transform_3(%arg0: i32) -> (i32, i32) {
    %c0_i32 = arith.constant 0 : i32
    %c0_i32_0 = arith.constant 0 : i32
    %c0_i32_1 = arith.constant 0 : i32
    return %c0_i32, %c0_i32_0 : i32, i32
  }
  func.func @transform_4(%arg0: i32) -> (i32, i32) {
    %c0_i32 = arith.constant 0 : i32
    %c0_i32_0 = arith.constant 0 : i32
    %c0_i32_1 = arith.constant 0 : i32
    return %c0_i32, %c0_i32_0 : i32, i32
  }
  func.func @transform_5(%arg0: i32) -> (i32, i32) {
    %c0_i32 = arith.constant 0 : i32
    %c0_i32_0 = arith.constant 0 : i32
    %c0_i32_1 = arith.constant 0 : i32
    return %c0_i32, %c0_i32_0 : i32, i32
  }
  func.func @transform_6(%arg0: i32) -> (i32, i32) {
    %c0_i32 = arith.constant 0 : i32
    %c0_i32_0 = arith.constant 0 : i32
    %c0_i32_1 = arith.constant 0 : i32
    return %c0_i32, %c0_i32_0 : i32, i32
  }
  func.func @transform_7(%arg0: i32) -> (i32, i32) {
    %c0_i32 = arith.constant 0 : i32
    %c0_i32_0 = arith.constant 0 : i32
    %c0_i32_1 = arith.constant 0 : i32
    return %c0_i32, %c0_i32_0 : i32, i32
  }
  func.func @transform_8(%arg0: i32) -> (i32, i32) {
    %c0_i32 = arith.constant 0 : i32
    %c0_i32_0 = arith.constant 0 : i32
    %c0_i32_1 = arith.constant 0 : i32
    return %c0_i32, %c0_i32_0 : i32, i32
  }
  func.func @transform_9(%arg0: i32) -> (i32, i32) {
    %c0_i32 = arith.constant 0 : i32
    %c0_i32_0 = arith.constant 0 : i32
    return %arg0, %c0_i32 : i32, i32
  }
}

</mosaic_0001>

<bundles_post_ra>
// kernel: tpu_custom_call.1
= control target key start
LH: loop header
LB: loop body
LE: loop exit
PB: predicated region body
PF: predicated region fallthrough
CT: control target
= control target key end

     0   :  { %vm42_vm0 = vcmask 1043456   ;;  %vm38_vm1 = vcmask 31744   ;;  %vm78_vm2 = vcmask 130048   ;;  %vm148_vm5 = vcmask 64512   ;;  %s284_s1 = inlined_call_operand.vmem [shape: f32[4,16], index: 1, kind: input, shape index: {}]   ;;  %s285_s0 = inlined_call_operand.vmem [shape: f32[8,4], index: 0, kind: input, shape index: {}]   ;;  %s286_s2 = inlined_call_operand.vmem [shape: f32[1,16], index: 2, kind: input, shape index: {}]   ;;  %s287_s4 = inlined_call_operand.vmem [shape: f32[1,16], index: 4, kind: input, shape index: {}]   ;;  %s288_s3 = inlined_call_operand.vmem [shape: f32[16,16], index: 3, kind: input, shape index: {}]   ;;  %s289_s6 = inlined_call_operand.vmem [shape: f32[1,8], index: 6, kind: input, shape index: {}]   ;;  %s290_s5 = inlined_call_operand.vmem [shape: f32[16,8], index: 5, kind: input, shape index: {}]   ;;  %s291_s8 = inlined_call_operand.vmem [shape: f32[1,3], index: 8, kind: input, shape index: {}]   ;;  %s292_s7 = inlined_call_operand.vmem [shape: f32[8,3], index: 7, kind: input, shape index: {}]   ;;  %s293_s9 = inlined_call_operand.vmem [shape: f32[8,3], index: 9, kind: output, shape index: {}]  }
   0x1   :  { %v33_v0 = vld [vmem:[%s284_s1] sm:$0xf]  ;;  %v73_v2 = vld [vmem:[%s288_s3 + $0x8] sm:$0xff]  ;;  %vm172_vm7 = vcmask 23552  }
   0x2   :  { %v32_v1 = vld [vmem:[%s285_s0] sm:$0xff]  ;;  %178 = vmatpush.msk.msra.mxu0 %vm42_vm0, %v33_v0  ;;  %96 = vmatpush.msra.mxu1 %v73_v2  ;;  %v109_v12 = vld [vmem:[%s290_s5 + $0x8] sm:$0xff] }
   0x3   :  { %179 = vmatmul.msk.f32.vlgmr.msra.gmra.mxu0 %vm38_vm1, %v32_v1  ;;  %v72_v3 = vld [vmem:[%s288_s3] sm:$0xff]  ;;  %131 = vmatpush.msra.mxu2 %v109_v12 }
   0x4   :  { %97 = vmatpush.msra.mxu1 %v72_v3  ;;  %v186_v4 = vld [vmem:[%s286_s2] ss:$0 sm:$0xff] }
   0x5   :  { %v108_v13 = vld [vmem:[%s290_s5] sm:$0xff] }
   0x6   :  { %132 = vmatpush.msra.mxu2 %v108_v13  ;;  %v187_v14 = vld [vmem:[%s287_s4] ss:$0 sm:$0xff] }
   0x7   :  { %v143_v22 = vld [vmem:[%s292_s7] sm:$0xff] }
   0x8   :  { %167 = vmatpush.msra.mxu3 %v143_v22  ;;  %v188_v23 = vld [vmem:[%s289_s6] ss:$0 sm:$0xff] }
   0x9   :  { %v189_v31 = vld [vmem:[%s291_s8] ss:$0 sm:$0xff] }
  0x80   :  { %v63_v5 = vpop.f32.mrf.mxu0 }
  0x81   :  { %v64_v6 = vadd.f32 %v186_v4, %v63_v5 }
  0x83   :  { %v67_v7 = vmin.f32 %v64_v6, 0.0  ;;  %vm66_vm3 = vcmp.gt.f32.partialorder %v64_v6, 0.0 }
  0x85   :  { %v68_v8 = vmul.f32 1.442695, %v67_v7 }
  0x87   :  { %190 = vpow2.f32 %v68_v8 }
  0x8d   :  { %v191_v9 = vpop.eup %190 }
  0x8e   :  { %v180_v10 = vadd.f32 -1.0, %v191_v9 }
  0x90   :  { %v71_v11 = vsel %vm66_vm3, %v64_v6, %v180_v10 }
  0x91   :  { %181 = vmatmul.msk.f32.vlgmr.msra.gmra.mxu1 %vm78_vm2, %v71_v11 }
 0x10e   :  { %v99_v15 = vpop.f32.mrf.mxu1 }
 0x10f   :  { %v100_v16 = vadd.f32 %v187_v14, %v99_v15 }
 0x111   :  { %v103_v17 = vmin.f32 %v100_v16, 0.0  ;;  %vm102_vm4 = vcmp.gt.f32.partialorder %v100_v16, 0.0 }
 0x113   :  { %v104_v18 = vmul.f32 1.442695, %v103_v17 }
 0x115   :  { %192 = vpow2.f32 %v104_v18 }
 0x11b   :  { %v193_v19 = vpop.eup %192 }
 0x11c   :  { %v182_v20 = vadd.f32 -1.0, %v193_v19 }
 0x11e   :  { %v107_v21 = vsel %vm102_vm4, %v100_v16, %v182_v20 }
 0x11f   :  { %183 = vmatmul.msk.f32.vlgmr.msra.gmra.mxu2 %vm78_vm2, %v107_v21 }
 0x1a2   :  { %v134_v24 = vpop.f32.mrf.mxu2 }
 0x1a3   :  { %v135_v25 = vadd.f32 %v188_v23, %v134_v24 }
 0x1a5   :  { %v138_v26 = vmin.f32 %v135_v25, 0.0  ;;  %vm137_vm6 = vcmp.gt.f32.partialorder %v135_v25, 0.0 }
 0x1a7   :  { %v139_v27 = vmul.f32 1.442695, %v138_v26 }
 0x1a9   :  { %194 = vpow2.f32 %v139_v27 }
 0x1af   :  { %v195_v28 = vpop.eup %194 }
 0x1b0   :  { %v184_v29 = vadd.f32 -1.0, %v195_v28 }
 0x1b2   :  { %v142_v30 = vsel %vm137_vm6, %v135_v25, %v184_v29 }
 0x1b3   :  { %185 = vmatmul.msk.f32.vlgmr.msra.gmra.mxu3 %vm148_vm5, %v142_v30 }
 0x236   :  { %v169_v32 = vpop.f32.mrf.mxu3 }
 0x237   :  { %v170_v33 = vadd.f32 %v189_v31, %v169_v32 }
 0x239   :  { %173 = vst.msk [vmem:[%s293_s9] sm:$0xff] %vm172_vm7, %v170_v33 }

</bundles_post_ra>
